<compile_context>
chip_gen: v7x
topology: tpu7x:2x2x1
jax: 0.10.0
libtpu: 0.0.40
codegen_flags: <defaults>
</compile_context>

<pallas_src>
import math

import jax
import jax.numpy as jnp
from jax.experimental import pallas as pl
from jax.experimental.pallas import tpu as pltpu


def _round_up(x, m):
    return (x + m - 1) // m * m


def _pad2d(a, rows, cols):
    r, c = a.shape
    if r == rows and c == cols:
        return a                      # skip the O(N*K) pad when already aligned
    return jnp.pad(a, ((0, rows - r), (0, cols - c)))


def masked_linear_kernel(x_ref, w_ref, m_ref, b_ref, o_ref, acc_ref):
    # x_ref:   (tm, tk) bf16        w_ref: (tk, tn) bf16 (weight.T tile)
    # m_ref:   (tk, tn) int8 {0,1}  b_ref: (1, tn) f32
    # o_ref:   (tm, tn)             acc_ref: (tm, tn) f32, resident across k
    @pl.when(pl.program_id(2) == 0)
    def _():
        acc_ref[...] = jnp.zeros_like(acc_ref)

    # Apply the prune mask on the VPU in the compute dtype ({0,1} is exact).
    wm = w_ref[...] * m_ref[...].astype(w_ref.dtype)

    # Canonical (tm,tk)@(tk,tn) MXU matmul, f32 accumulation, no transpose.
    acc_ref[...] += jnp.dot(x_ref[...], wm, preferred_element_type=jnp.float32)

    @pl.when(pl.program_id(2) == pl.num_programs(2) - 1)
    def _():
        o_ref[...] = (acc_ref[...] + b_ref[...]).astype(o_ref.dtype)


def masked_linear(x, weight, mask, bias=None, *, tm=512, tn=512, tk=1024,
                  compute_dtype=jnp.bfloat16):
    """y = x @ (weight * mask).T + bias, matching torch.nn.functional.linear.

    x: (..., in_features); weight/mask: (out_features, in_features);
    bias: (out_features,) or None.  mask is expected to hold {0, 1} values
    (as produced by MaskedLinear.prune); MXU operands are bf16 with float32
    accumulation, so results match an f32 reference to ~1e-2 relative.
    """
    *lead, K = x.shape
    N, K_w = weight.shape
    assert K_w == K, "weight in_features must match x"
    M = 1
    for d in lead:
        M *= d
    x2d = x.reshape(M, K)
    out_dtype = x.dtype

    if bias is None:
        bias = jnp.zeros((N,), jnp.float32)

    # ---- tile selection ---------------------------------------------------
    # Clamp tiles to the aligned problem size: sublane dims multiples of 16
    # (bf16 packing), lane dims multiples of 128.
    tm = min(tm, _round_up(M, 16))
    tn = min(tn, _round_up(N, 128))
    tk = min(tk, _round_up(K, 128))

    # v7x megacore: its two TensorCores split the "parallel" grid axes.  If
    # both parallel axes collapse to a single block, split N into >=2 blocks
    # when the shape allows it.
    if _round_up(M, tm) // tm == 1 and _round_up(N, tn) // tn == 1:
        n_aligned = _round_up(N, 128)
        if n_aligned >= 256:
            tn = _round_up(n_aligned // 2, 128)

    Mp, Np, Kp = _round_up(M, tm), _round_up(N, tn), _round_up(K, tk)

    # ---- operand prep (cast BEFORE padding; layouts are kernel-native) -----
    xp = _pad2d(x2d.astype(compute_dtype), Mp, Kp)               # (Mp, Kp) bf16
    wt = _pad2d(weight.T.astype(compute_dtype), Kp, Np)          # (Kp, Np) bf16
    mt = _pad2d(mask.T.astype(jnp.int8), Kp, Np)                 # (Kp, Np) int8
    bp = _pad2d(bias.astype(jnp.float32).reshape(1, N), 1, Np)   # (1, Np) f32

    grid = (Mp // tm, Np // tn, Kp // tk)

    # Generation-aware VMEM budget (v7x: 64 MiB/core vs 128 MiB on v5e/v6e).
    try:
        vmem_cap = pltpu.get_tpu_info().vmem_capacity_bytes
    except Exception:
        vmem_cap = 64 * 1024 * 1024
    vmem_limit = int(min(vmem_cap * 3 // 4, 96 * 1024 * 1024))

    c_item = jnp.dtype(compute_dtype).itemsize
    cost = pl.CostEstimate(
        flops=2 * M * N * K,
        transcendentals=0,
        bytes_accessed=(xp.size * c_item + wt.size * c_item + mt.size
                        + bp.size * 4 + Mp * Np * jnp.dtype(out_dtype).itemsize),
    )

    out = pl.pallas_call(
        masked_linear_kernel,
        out_shape=jax.ShapeDtypeStruct((Mp, Np), out_dtype),
        grid_spec=pltpu.PrefetchScalarGridSpec(
            num_scalar_prefetch=0,
            grid=grid,
            in_specs=[
                pl.BlockSpec((tm, tk), lambda i, j, k: (i, k)),   # x
                pl.BlockSpec((tk, tn), lambda i, j, k: (k, j)),   # weight.T
                pl.BlockSpec((tk, tn), lambda i, j, k: (k, j)),   # mask.T (int8)
                pl.BlockSpec((1, tn), lambda i, j, k: (0, j)),    # bias
            ],
            out_specs=pl.BlockSpec((tm, tn), lambda i, j, k: (i, j)),
            scratch_shapes=[pltpu.VMEM((tm, tn), jnp.float32)],
        ),
        compiler_params=pltpu.CompilerParams(
            dimension_semantics=("parallel", "parallel", "arbitrary"),
            vmem_limit_bytes=vmem_limit,
        ),
        cost_estimate=cost,
    )(xp, wt, mt, bp)

    return out[:M, :N].reshape(*lead, N)


def init_masked_linear_params(key, in_features, out_features, dtype=jnp.float32):
    """Deterministic init mirroring nn.Linear / MaskedLinear.reset_parameters()."""
    kw, kb = jax.random.split(key)
    # kaiming_uniform_(a=sqrt(5)) on an (out, in) weight -> bound = 1/sqrt(in)
    w_bound = 1.0 / math.sqrt(in_features)
    weight = jax.random.uniform(kw, (out_features, in_features), dtype,
                                minval=-w_bound, maxval=w_bound)
    b_bound = 1.0 / math.sqrt(in_features)
    bias = jax.random.uniform(kb, (out_features,), dtype,
                              minval=-b_bound, maxval=b_bound)
    mask = jnp.ones((out_features, in_features), dtype)
    return weight, mask, bias


# TODO(synk): MaskedLinear.prune() is host-side parameter surgery (numpy mask
# update), not part of the forward pass; it is emulated below by zeroing mask
# entries rather than implemented as a kernel.

if __name__ == "__main__":
    key = jax.random.PRNGKey(0)
    k_x, k_p = jax.random.split(key)

    batch, seq, in_features, out_features = 2, 8, 32, 64

    x = jax.random.normal(k_x, (batch, seq, in_features), jnp.float32)
    weight, mask, bias = init_masked_linear_params(k_p, in_features, out_features)

    # Emulate a prune() having zeroed some mask entries ({0,1} mask).
    mask = jnp.where(jnp.abs(weight) < 0.02, 0.0, mask)

    out = masked_linear(x, weight, mask, bias)
    out = jax.block_until_ready(out)

    # Reference in plain JAX (same math as F.linear(x, W*mask, b)), computed
    # in f32; kernel uses bf16 MXU operands with f32 accumulation, so compare
    # with a relaxed tolerance.
    ref = x @ (weight * mask).T + bias
    assert out.shape == (batch, seq, out_features)
    assert jnp.allclose(out, ref, atol=5e-2, rtol=5e-2), \
        float(jnp.max(jnp.abs(out - ref)))

    print("KERNEL_OK")
</pallas_src>

<mosaic_0001>
module attributes {stable_mosaic.version = 11 : i64} {
  func.func @masked_linear_kernel(%arg0: i32, %arg1: i32, %arg2: i32, %arg3: memref<16x128xbf16, #tpu.memory_space<vmem>>, %arg4: memref<128x128xbf16, #tpu.memory_space<vmem>>, %arg5: memref<128x128xi8, #tpu.memory_space<vmem>>, %arg6: memref<1x128xf32, #tpu.memory_space<vmem>>, %arg7: memref<16x128xf32, #tpu.memory_space<vmem>>, %arg8: memref<16x128xf32, #tpu.memory_space<vmem>>) attributes {dimension_semantics = [#tpu.dimension_semantics<parallel>, #tpu.dimension_semantics<parallel>, #tpu.dimension_semantics<arbitrary>], iteration_bounds = array<i64: 1, 1, 1>, scalar_prefetch = 0 : i64, scratch_operands = 1 : i64, tpu.core_type = #tpu.core_type<tc>, window_params = [{transform_indices = @transform_0, window_bounds = array<i64: 16, 128>}, {transform_indices = @transform_1, window_bounds = array<i64: 128, 128>}, {transform_indices = @transform_2, window_bounds = array<i64: 128, 128>}, {transform_indices = @transform_3, window_bounds = array<i64: 1, 128>}, {transform_indices = @transform_4, window_bounds = array<i64: 16, 128>}]} {
    %c0_i32 = arith.constant 0 : i32
    %0 = arith.cmpi eq, %arg2, %c0_i32 : i32
    %1 = arith.extui %0 : i1 to i32
    %c0_i32_0 = arith.constant 0 : i32
    %2 = arith.cmpi ne, %1, %c0_i32_0 : i32
    scf.if %2 {
      %cst_12 = arith.constant 0.000000e+00 : f32
      %15 = vector.broadcast %cst_12 : f32 to vector<16x128xf32>
      %c0_13 = arith.constant 0 : index
      %c0_14 = arith.constant 0 : index
      %16 = vector.load %arg8[%c0_13, %c0_14] : memref<16x128xf32, #tpu.memory_space<vmem>>, vector<16x128xf32>
      tpu.vector_store %arg8[%c0_13, %c0_14], %15 {strides = array<i32>} : memref<16x128xf32, #tpu.memory_space<vmem>>, vector<16x128xf32>,
    } else {
    }
    %c0 = arith.constant 0 : index
    %c0_1 = arith.constant 0 : index
    %3 = vector.load %arg4[%c0, %c0_1] : memref<128x128xbf16, #tpu.memory_space<vmem>>, vector<128x128xbf16>
    %c0_2 = arith.constant 0 : index
    %c0_3 = arith.constant 0 : index
    %4 = vector.load %arg5[%c0_2, %c0_3] : memref<128x128xi8, #tpu.memory_space<vmem>>, vector<128x128xi8>
    %5 = arith.sitofp %4 : vector<128x128xi8> to vector<128x128xbf16>
    %6 = arith.mulf %3, %5 : vector<128x128xbf16>
    %c0_4 = arith.constant 0 : index
    %c0_5 = arith.constant 0 : index
    %7 = vector.load %arg8[%c0_4, %c0_5] : memref<16x128xf32, #tpu.memory_space<vmem>>, vector<16x128xf32>
    %c0_6 = arith.constant 0 : index
    %c0_7 = arith.constant 0 : index
    %8 = vector.load %arg3[%c0_6, %c0_7] : memref<16x128xbf16, #tpu.memory_space<vmem>>, vector<16x128xbf16>
    %cst = arith.constant dense<0.000000e+00> : vector<16x128xf32>
    %9 = tpu.matmul %8, %6, %cst {dimension_numbers = #tpu.dot_dimension_numbers<[1], [0], [0], [1], [0, 0, 1, 1], [], []>} : vector<16x128xbf16>, vector<128x128xbf16>, vector<16x128xf32> -> vector<16x128xf32>
    %10 = arith.addf %7, %9 : vector<16x128xf32>
    %c0_8 = arith.constant 0 : index
    %c0_9 = arith.constant 0 : index
    %11 = vector.load %arg8[%c0_8, %c0_9] : memref<16x128xf32, #tpu.memory_space<vmem>>, vector<16x128xf32>
    tpu.vector_store %arg8[%c0_8, %c0_9], %10 {strides = array<i32>} : memref<16x128xf32, #tpu.memory_space<vmem>>, vector<16x128xf32>,
    %c0_i32_10 = arith.constant 0 : i32
    %12 = arith.cmpi eq, %arg2, %c0_i32_10 : i32
    %13 = arith.extui %12 : i1 to i32
    %c0_i32_11 = arith.constant 0 : i32
    %14 = arith.cmpi ne, %13, %c0_i32_11 : i32
    scf.if %14 {
      %c0_12 = arith.constant 0 : index
      %c0_13 = arith.constant 0 : index
      %15 = vector.load %arg8[%c0_12, %c0_13] : memref<16x128xf32, #tpu.memory_space<vmem>>, vector<16x128xf32>
      %c0_14 = arith.constant 0 : index
      %c0_15 = arith.constant 0 : index
      %16 = vector.load %arg6[%c0_14, %c0_15] : memref<1x128xf32, #tpu.memory_space<vmem>>, vector<1x128xf32>
      %17 = vector.broadcast %16 : vector<1x128xf32> to vector<16x128xf32>
      %18 = arith.addf %15, %17 : vector<16x128xf32>
      %c0_16 = arith.constant 0 : index
      %c0_17 = arith.constant 0 : index
      %19 = vector.load %arg7[%c0_16, %c0_17] : memref<16x128xf32, #tpu.memory_space<vmem>>, vector<16x128xf32>
      tpu.vector_store %arg7[%c0_16, %c0_17], %18 {strides = array<i32>} : memref<16x128xf32, #tpu.memory_space<vmem>>, vector<16x128xf32>,
    } else {
    }
    return
  }
  func.func @transform_0(%arg0: i32, %arg1: i32, %arg2: i32) -> (i32, i32) {
    %c0_i32 = arith.constant 0 : i32
    return %arg0, %arg2 : i32, i32
  }
  func.func @transform_1(%arg0: i32, %arg1: i32, %arg2: i32) -> (i32, i32) {
    %c0_i32 = arith.constant 0 : i32
    return %arg2, %arg1 : i32, i32
  }
  func.func @transform_2(%arg0: i32, %arg1: i32, %arg2: i32) -> (i32, i32) {
    %c0_i32 = arith.constant 0 : i32
    return %arg2, %arg1 : i32, i32
  }
  func.func @transform_3(%arg0: i32, %arg1: i32, %arg2: i32) -> (i32, i32) {
    %c0_i32 = arith.constant 0 : i32
    %c0_i32_0 = arith.constant 0 : i32
    return %c0_i32, %arg1 : i32, i32
  }
  func.func @transform_4(%arg0: i32, %arg1: i32, %arg2: i32) -> (i32, i32) {
    %c0_i32 = arith.constant 0 : i32
    return %arg0, %arg1 : i32, i32
  }
}

</mosaic_0001>

<bundles_post_ra>
// kernel: tpu_custom_call.1
= control target key start
LH: loop header
LB: loop body
LE: loop exit
PB: predicated region body
PF: predicated region fallthrough
CT: control target
= control target key end

     0   :  { %9 = vsyncpa [#allocation4], 0  ;;  %s571_s0 = inlined_call_operand.hbm [shape: bf16[16,128], index: 0, kind: input, shape index: {}]   ;;  %s572_s1 = inlined_call_operand.hbm [shape: bf16[128,128], index: 1, kind: input, shape index: {}]   ;;  %s573_s2 = inlined_call_operand.hbm [shape: s8[128,128], index: 2, kind: input, shape index: {}]   ;;  %s574_s3 = inlined_call_operand.vmem [shape: f32[1,128], index: 3, kind: input, shape index: {}]   ;;  %s575_s4 = inlined_call_operand.hbm [shape: f32[16,128], index: 4, kind: output, shape index: {}]  }
   0x1   :  { %10 = vsyncpa [#allocation7], 0 }
   0x2   :  { %11 = vsyncpa [#allocation5], 0  ;;  %s463_s15 = smov [#allocation6]   ;;  %s464_s17 = smov [#allocation3]  }
   0x3   :  { %s29_s16 = sshll.u32 %s463_s15, 4  ;;  %s17_s18 = sshll.u32 %s464_s17, 4  ;;  %s30_s16 = int_to_ptr.vmem [resolvable:$true] %s29_s16  ;;  %s498_s18 = int_to_ptr.vmem [resolvable:$true] %s17_s18 }
   0x4   :  { %s369_s21 = scalar_lea.hbm %s572_s1, 1024 }
   0x5   :  { %p370_p0 = scmp.ne.s32.totalorder %s572_s1, %s369_s21  ;;  %p373_p1 = scmp.lt.u32.totalorder %s369_s21, %s572_s1 }
   0x7   :  { %p375_p2 = pnand %p373_p1, %p370_p0 }
   0x9   :  { %378 = shalt.err (!%p375_p2)
}
   0xa   :  { %s379_s26 = scalar_lea.vmem %s30_s16, 1024  ;;  %p384_p4 = scmp.lt.s32.totalorder %s30_s16, %s30_s16 }
   0xb   :  { %p380_p3 = scmp.ne.s32.totalorder %s30_s16, %s379_s26  ;;  %p385_p5 = scmp.lt.s32.totalorder %s379_s26, %s379_s26 }
   0xd   :  { %p386_p6 = por %p385_p5, %p384_p4 }
   0xf   :  { %p387_p7 = pnand %p386_p6, %p380_p3 }
  0x11   :  { %390 = shalt.err (!%p387_p7)
}
  0x12   :  { %s465_s27 = smov 64   ;;  %s466_s28 = smov 4  }
  0x13   :  { %35 = dma.hbm_to_vmem [thread:$0]  %s572_s1, 1024, %s30_s16, [#allocation7], %s465_s27, %s465_s27, %s466_s28  }
  0x14   :  { %s391_s7 = scalar_lea.hbm %s571_s0, 128 }
  0x15   :  { %p392_p8 = scmp.ne.s32.totalorder %s571_s0, %s391_s7  ;;  %p395_p9 = scmp.lt.u32.totalorder %s391_s7, %s571_s0 }
  0x17   :  { %p397_p10 = pnand %p395_p9, %p392_p8 }
  0x19   :  { %400 = shalt.err (!%p397_p10)
}
  0x1a   :  { %s401_s12 = scalar_lea.vmem %s498_s18, 128  ;;  %p406_p12 = scmp.lt.s32.totalorder %s498_s18, %s498_s18 }
  0x1b   :  { %p402_p11 = scmp.ne.s32.totalorder %s498_s18, %s401_s12  ;;  %p407_p13 = scmp.lt.s32.totalorder %s401_s12, %s401_s12 }
  0x1d   :  { %p408_p0 = por %p407_p13, %p406_p12 }
  0x1f   :  { %p409_p1 = pnand %p408_p0, %p402_p11 }
  0x21   :  { %412 = shalt.err (!%p409_p1)
}
  0x22   :  { %23 = dma.hbm_to_vmem [thread:$0]  %s571_s0, 128, %s498_s18, [#allocation4], %s465_s27, %s465_s27, %s466_s28  }
  0x23   :  { %s467_s14 = smov [#allocation8]   ;;  %s413_s19 = scalar_lea.hbm %s573_s2, 512 }
  0x24   :  { %s41_s15 = sshll.u32 %s467_s14, 4  ;;  %p414_p2 = scmp.ne.s32.totalorder %s573_s2, %s413_s19  ;;  %s42_s15 = int_to_ptr.vmem [resolvable:$true] %s41_s15 }
  0x25   :  { %p417_p3 = scmp.lt.u32.totalorder %s413_s19, %s573_s2 }
  0x27   :  { %p419_p4 = pnand %p417_p3, %p414_p2 }
  0x29   :  { %422 = shalt.err (!%p419_p4)
}
  0x2a   :  { %s423_s24 = scalar_lea.vmem %s42_s15, 512  ;;  %p428_p6 = scmp.lt.s32.totalorder %s42_s15, %s42_s15 }
  0x2b   :  { %p424_p5 = scmp.ne.s32.totalorder %s42_s15, %s423_s24  ;;  %p429_p7 = scmp.lt.s32.totalorder %s423_s24, %s423_s24 }
  0x2d   :  { %p430_p8 = por %p429_p7, %p428_p6 }
  0x2f   :  { %p431_p9 = pnand %p430_p8, %p424_p5 }
  0x31   :  { %434 = shalt.err (!%p431_p9)
}
  0x32   :  { %s468_s0 = smov 128   ;;  %s469_s18 = smov 8  }
  0x33   :  { %47 = dma.hbm_to_vmem [thread:$0]  %s573_s2, 512, %s42_s15, [#allocation7], %s468_s0, %s468_s0, %s469_s18  }
  0x34   :  { %457 = dma.done.wait [#allocation4], 128  }
  0x35   :  { %458 = vsyncadd [#allocation4], 4294967168 }
  0x36   :  { %459 = dma.done.wait [#allocation7], 1536  }
  0x37   :  { %460 = vsyncadd [#allocation7], 4294965760  ;;  %v470_v0 = vmov 0.0   ;;  %vm471_vm0 = vmmov 0   ;;  %v82_v1 = vld [vmem:[#allocation8] sm:$0xff]  ;;  %v83_v8 = vld [vmem:[#allocation8 + $0x8] sm:$0xff] }
  0x38   :  { %338 = vmatprep.subr.bf16.mxu0 %v470_v0  ;;  %354 = vmatprep.mubr.msk.bf16.mxu0 %vm471_vm0, %v470_v0  ;;  %v66_v2 = vld [vmem:[#allocation6] sm:$0xf]  ;;  %v67_v3 = vld [vmem:[#allocation6 + $0x4] sm:$0xf]  ;;  %v86_v4 = vunpack.c.l.s8.bf16 %v82_v1  ;;  %v87_v5 = vunpack.c.h.s8.bf16 %v82_v1  ;;  %v68_v6 = vld [vmem:[#allocation6 + $0x8] sm:$0xf]  ;;  %v88_v13 = vunpack.c.l.s8.bf16 %v83_v8  ;;  %v89_v14 = vunpack.c.h.s8.bf16 %v83_v8 }
  0x39   :  { %v69_v7 = vld [vmem:[#allocation6 + $0xc] sm:$0xf]  ;;  %v70_v19 = vld [vmem:[#allocation6 + $0x10] sm:$0xf]  ;;  %v71_v20 = vld [vmem:[#allocation6 + $0x14] sm:$0xf] }
  0x3a   :  { %v303_v9 = vcombine.low %v86_v4, %v86_v4  ;;  %v304_v10 = vcombine.high %v86_v4, %v86_v4  ;;  %v305_v11 = vcombine.low %v87_v5, %v87_v5  ;;  %v306_v12 = vcombine.high %v87_v5, %v87_v5  ;;  %v84_v23 = vld [vmem:[#allocation8 + $0x10] sm:$0xff]  ;;  %v72_v30 = vld [vmem:[#allocation6 + $0x18] sm:$0xf]  ;;  %v73_v32 = vld [vmem:[#allocation6 + $0x1c] sm:$0xf]  ;;  %s472_s28 = smov [#allocation9]  }
  0x3b   :  { %v307_v21 = vcombine.low %v88_v13, %v88_v13  ;;  %v308_v22 = vcombine.high %v88_v13, %v88_v13  ;;  %v309_v25 = vcombine.low %v89_v14, %v89_v14  ;;  %v310_v26 = vcombine.high %v89_v14, %v89_v14  ;;  %v74_v39 = vld [vmem:[#allocation6 + $0x20] sm:$0xf]  ;;  %v75_v40 = vld [vmem:[#allocation6 + $0x24] sm:$0xf]  ;;  %v85_v41 = vld [vmem:[#allocation8 + $0x18] sm:$0xff]  ;;  %s290_s29 = sshll.u32 %s472_s28, 4  ;;  %s291_s29 = int_to_ptr.vmem [resolvable:$true] %s290_s29 }
  0x3c   :  { %v150_v15 = vmul.bf16 %v303_v9, %v66_v2  ;;  %v151_v16 = vmul.bf16 %v304_v10, %v67_v3  ;;  %v152_v17 = vmul.bf16 %v305_v11, %v68_v6  ;;  %v153_v18 = vmul.bf16 %v306_v12, %v69_v7  ;;  %v76_v47 = vld [vmem:[#allocation6 + $0x28] sm:$0xf]  ;;  %v77_v49 = vld [vmem:[#allocation6 + $0x2c] sm:$0xf]  ;;  %v78_v56 = vld [vmem:[#allocation6 + $0x30] sm:$0xf]  ;;  %p440_p11 = scmp.lt.s32.totalorder %s291_s29, %s291_s29 }
  0x3d   :  { %v154_v28 = vmul.bf16 %v307_v21, %v70_v19  ;;  %v155_v29 = vmul.bf16 %v308_v22, %v71_v20  ;;  %v90_v31 = vunpack.c.l.s8.bf16 %v84_v23  ;;  %v156_v33 = vmul.bf16 %v309_v25, %v72_v30  ;;  %v79_v57 = vld [vmem:[#allocation6 + $0x34] sm:$0xf]  ;;  %v80_v63 = vld [vmem:[#allocation6 + $0x38] sm:$0xf]  ;;  %v81_v1 = vld [vmem:[#allocation6 + $0x3c] sm:$0xf] }
  0x3e   :  { %v320_v24 = vcombine.low %v150_v15, %v151_v16  ;;  %v321_v27 = vcombine.low %v152_v17, %v153_v18  ;;  %v91_v34 = vunpack.c.h.s8.bf16 %v84_v23  ;;  %v157_v36 = vmul.bf16 %v310_v26, %v73_v32  ;;  %v368_v6 = vld [vmem:[#allocation3] sm:$0xff]   ;;  %s435_s30 = scalar_lea.vmem %s291_s29, 256 }
  0x3f   :  { %v322_v35 = vcombine.low %v154_v28, %v155_v29  ;;  %v311_v37 = vcombine.low %v90_v31, %v90_v31  ;;  %v312_v38 = vcombine.high %v90_v31, %v90_v31  ;;  %v92_v48 = vunpack.c.l.s8.bf16 %v85_v41  ;;  %v328_v7 = vld [vmem:[%s574_s3] ss:$0 sm:$0xff]  ;;  %p436_p10 = scmp.ne.s32.totalorder %s291_s29, %s435_s30  ;;  %p441_p12 = scmp.lt.s32.totalorder %s435_s30, %s435_s30 }
  0x40   :  { %339 = vmatpush3.bf16.msra.mxu0 %v320_v24  ;;  %v313_v42 = vcombine.low %v91_v34, %v91_v34  ;;  %v314_v43 = vcombine.high %v91_v34, %v91_v34  ;;  %v323_v44 = vcombine.low %v156_v33, %v157_v36  ;;  %v93_v51 = vunpack.c.h.s8.bf16 %v85_v41 }
  0x41   :  { %340 = vmatprep.subr.bf16.mxu0 %v470_v0  ;;  %v158_v45 = vmul.bf16 %v311_v37, %v74_v39  ;;  %v159_v46 = vmul.bf16 %v312_v38, %v75_v40  ;;  %v315_v54 = vcombine.low %v92_v48, %v92_v48  ;;  %v316_v55 = vcombine.high %v92_v48, %v92_v48  ;;  %p442_p13 = por %p441_p12, %p440_p11 }
  0x42   :  { %v160_v50 = vmul.bf16 %v313_v42, %v76_v47  ;;  %v161_v53 = vmul.bf16 %v314_v43, %v77_v49  ;;  %v317_v58 = vcombine.low %v93_v51, %v93_v51  ;;  %v318_v62 = vcombine.high %v93_v51, %v93_v51 }
  0x43   :  { %v324_v52 = vcombine.low %v158_v45, %v159_v46  ;;  %v162_v60 = vmul.bf16 %v315_v54, %v78_v56  ;;  %v163_v61 = vmul.bf16 %v316_v55, %v79_v57  ;;  %p443_p0 = pnand %p442_p13, %p436_p10 }
  0x44   :  { %341 = vmatpush3.bf16.msra.mxu0 %v321_v27  ;;  %v325_v59 = vcombine.low %v160_v50, %v161_v53  ;;  %v164_v3 = vmul.bf16 %v317_v58, %v80_v63  ;;  %v165_v4 = vmul.bf16 %v318_v62, %v81_v1 }
  0x45   :  { %342 = vmatprep.subr.bf16.mxu0 %v470_v0  ;;  %v326_v2 = vcombine.low %v162_v60, %v163_v61 }
  0x46   :  { %v327_v5 = vcombine.low %v164_v3, %v165_v4 }
  0x48   :  { %343 = vmatpush3.bf16.msra.mxu0 %v322_v35 }
  0x49   :  { %344 = vmatprep.subr.bf16.mxu0 %v470_v0 }
  0x4c   :  { %345 = vmatpush3.bf16.msra.mxu0 %v323_v44 }
  0x4d   :  { %346 = vmatprep.subr.bf16.mxu0 %v470_v0 }
  0x50   :  { %347 = vmatpush3.bf16.msra.mxu0 %v324_v52 }
  0x51   :  { %348 = vmatprep.subr.bf16.mxu0 %v470_v0 }
  0x54   :  { %349 = vmatpush3.bf16.msra.mxu0 %v325_v59 }
  0x55   :  { %350 = vmatprep.subr.bf16.mxu0 %v470_v0 }
  0x58   :  { %351 = vmatpush3.bf16.msra.mxu0 %v326_v2 }
  0x59   :  { %352 = vmatprep.subr.bf16.mxu0 %v470_v0 }
  0x5c   :  { %353 = vmatpush3.bf16.msra.mxu0 %v327_v5 }
  0x5f   :  { %355 = vmatmul.mubr.bf16.vlgmr.msra.gmra.mrb[0].mxu0 %v368_v6 }
 0x132   :  { %v258_v8 = vpop.f32.mrb[0].mxu0 }
 0x133   :  { %v281_v9 = vadd.f32 %v328_v7, %v258_v8  ;;  %v356_v10 = vpop.f32.mrb[1].mxu0 }
 0x134   :  { %v261_v11 = vpop.f32.mrb[2].mxu0 }
 0x135   :  { %283 = vst [vmem:[#allocation9] sm:$0xff] %v281_v9  ;;  %v282_v12 = vadd.f32 %v328_v7, %v261_v11  ;;  %v357_v13 = vpop.f32.mrb[3].mxu0 }
 0x137   :  { %284 = vst [vmem:[#allocation9 + $0x8] sm:$0xff] %v282_v12 }
 0x138   :  { %446 = shalt.err (!%p443_p0)
}
 0x139   :  { %s447_s6 = scalar_lea.hbm %s575_s4, 256 }
 0x13a   :  { %p448_p1 = scmp.ne.s32.totalorder %s575_s4, %s447_s6  ;;  %p451_p2 = scmp.lt.u32.totalorder %s447_s6, %s575_s4 }
 0x13c   :  { %p453_p3 = pnand %p451_p2, %p448_p1 }
 0x13e   :  { %456 = shalt.err (!%p453_p3)
}
 0x13f   :  { %296 = dma.vmem_to_hbm [thread:$0]  %s291_s29, 256, %s575_s4, [#allocation5], %s468_s0, %s468_s0, %s469_s18  }
 0x140   :  { %461 = dma.done.wait [#allocation5], 256  }
 0x141   :  { %462 = vsyncadd [#allocation5], 4294967040 }
 0x142   :  { %300 = vsyncpa [#allocation4], 1 }
 0x143   :  { %301 = vsyncpa [#allocation7], 1 }
 0x144   :  { %302 = vsyncpa [#allocation5], 1 }

</bundles_post_ra>
